<compile_context>
chip_gen: v7x
topology: tpu7x:2x2x1
jax: 0.10.0
libtpu: 0.0.40
codegen_flags: <defaults>
</compile_context>

<pallas_src>
import math

import jax
import jax.numpy as jnp
from jax import lax
from jax.experimental import pallas as pl
from jax.experimental.pallas import tpu as pltpu

ALPHA = 3.5
PHI = 1.618
FREQ = 1.0


def _num_parallel_blocks(B):
    """2-way parallel grid on dual-TensorCore chips (v7x); 1 fat step otherwise."""
    try:
        kind = jax.devices()[0].device_kind.lower()
    except Exception:
        kind = ""
    if B % 2 == 0 and ("v7" in kind or "7x" in kind):
        return 2
    return 1


def _make_kernel(Cin, W, N, K_pad):
    """Kernel over one lane-dense block: x (Cin, N) -> out (Cout, N)."""
    K_taps = 9 * Cin

    def kernel(x_ref, mm_ref, w_ref, o_ref, stack_ref):
        x = x_ref[0]                                            # (Cin, N), lane dense

        # Constant rows of the im2col stack: bias row of ones + zero padding rows.
        stack_ref[pl.ds(K_taps, 1), :] = jnp.ones((1, N), jnp.float32)
        if K_pad > K_taps + 1:
            stack_ref[pl.ds(K_taps + 1, K_pad - K_taps - 1), :] = jnp.zeros(
                (K_pad - K_taps - 1, N), jnp.float32)

        # One flat lane roll + one multiply by the precomputed (mask * mod) row
        # per conv tap; result rows go straight into the im2col scratch.
        for k in range(9):
            dy, dx = divmod(k, 3)
            d = (dy - 1) * W + (dx - 1)                         # flat source offset
            shifted = x if d == 0 else pltpu.roll(x, (-d) % N, axis=1)
            stack_ref[pl.ds(k * Cin, Cin), :] = shifted * mm_ref[pl.ds(k, 1), :]

        # Single fused MXU contraction: (Cout, K_pad) @ (K_pad, N).
        # Weights already carry the sin(2*pi*f*t) scale and the bias column.
        o_ref[0] = jnp.dot(w_ref[...], stack_ref[...],
                           preferred_element_type=jnp.float32).astype(o_ref.dtype)

    return kernel


def tfnp_forward(x, w, b, t=0.0, alpha=ALPHA, phi=PHI, f=FREQ, num_blocks=None):
    """Pallas implementation of TFNPLayer.forward. x: (B, Cin, H, W) f32."""
    B, Cin, H, W = x.shape
    Cout = w.shape[0]
    HW = H * W

    grid_b = num_blocks if num_blocks is not None else _num_parallel_blocks(B)
    if grid_b < 1 or B % grid_b != 0:
        grid_b = 1
    bpb = B // grid_b                 # batch images per grid block
    N = bpb * HW                      # lane width per block (multiple of 128)

    K_taps = 9 * Cin
    K_pad = ((K_taps + 1 + 7) // 8) * 8     # taps + bias row, padded to sublane mult.

    # --- lane-dense input layout: (grid_b, Cin, bpb*HW) -------------------------
    x = x.astype(jnp.float32)
    x_blk = (x.reshape(grid_b, bpb, Cin, HW)
               .transpose(0, 2, 1, 3)
               .reshape(grid_b, Cin, N))

    # --- constant per-tap (valid-mask * cos(twist) * phi) grid, at source pos ---
    phi_grid = jnp.linspace(0.0, 2.0 * math.pi, H, dtype=jnp.float32)[:, None]
    theta_grid = jnp.linspace(0.0, 2.0 * math.pi, W, dtype=jnp.float32)[None, :]
    twist = jnp.mod(theta_grid + alpha * phi_grid, 2.0 * math.pi)
    mod = jnp.cos(twist) * phi                                  # (H, W)
    mod_pad = jnp.pad(mod, 1)                                   # zero padded (H+2, W+2)
    modmask_img = jnp.stack(
        [mod_pad[dy:dy + H, dx:dx + W].reshape(HW)
         for dy in range(3) for dx in range(3)], axis=0)        # (9, HW)
    modmask = jnp.tile(modmask_img, (1, bpb)).astype(jnp.float32)   # (9, N)

    # --- fused weight matrix: conv taps + bias column, pre-scaled by sin term ---
    sin_t = jnp.sin(jnp.float32(2.0 * math.pi * f * t))
    w_flat = jnp.transpose(w.astype(jnp.float32), (2, 3, 1, 0)).reshape(K_taps, Cout)
    wb = jnp.concatenate(
        [w_flat,
         b.astype(jnp.float32).reshape(1, Cout),
         jnp.zeros((K_pad - K_taps - 1, Cout), jnp.float32)], axis=0)   # (K_pad, Cout)
    w2d = sin_t * wb.T                                           # (Cout, K_pad)

    kernel = _make_kernel(Cin, W, N, K_pad)

    out_blk = pl.pallas_call(
        kernel,
        out_shape=jax.ShapeDtypeStruct((grid_b, Cout, N), jnp.float32),
        grid=(grid_b,),
        in_specs=[
            pl.BlockSpec((1, Cin, N), lambda i: (i, 0, 0)),      # x (lane-dense)
            pl.BlockSpec((9, N), lambda i: (0, 0)),              # per-tap mask*mod
            pl.BlockSpec((Cout, K_pad), lambda i: (0, 0)),       # fused weights+bias
        ],
        out_specs=pl.BlockSpec((1, Cout, N), lambda i: (i, 0, 0)),
        scratch_shapes=[pltpu.VMEM((K_pad, N), jnp.float32)],    # im2col stack
        compiler_params=pltpu.CompilerParams(dimension_semantics=("parallel",)),
    )(x_blk, modmask, w2d)

    return (out_blk.reshape(grid_b, Cout, bpb, HW)
                   .transpose(0, 2, 1, 3)
                   .reshape(B, Cout, H, W))


def _reference(x, w, b, t, alpha=ALPHA, phi=PHI, f=FREQ):
    """Pure-JAX reference mirroring the PyTorch forward."""
    B, C, H, W = x.shape
    phi_grid = jnp.tile(jnp.linspace(0.0, 2.0 * math.pi, H)[:, None], (1, W))
    theta_grid = jnp.tile(jnp.linspace(0.0, 2.0 * math.pi, W)[None, :], (H, 1))
    twist = jnp.mod(theta_grid + alpha * phi_grid, 2.0 * math.pi)
    x_scaled = x * jnp.cos(twist)[None, None] * phi
    conv = lax.conv_general_dilated(
        x_scaled, w, window_strides=(1, 1), padding="SAME",
        dimension_numbers=("NCHW", "OIHW", "NCHW"),
        precision=lax.Precision.HIGHEST)
    conv = conv + b[None, :, None, None]
    return jnp.sin(2.0 * math.pi * f * t) * conv


if __name__ == "__main__":
    B, Cin, Cout, H, W = 2, 4, 8, 16, 16
    key = jax.random.PRNGKey(0)
    kx, kw, kb = jax.random.split(key, 3)

    x = jax.random.normal(kx, (B, Cin, H, W), dtype=jnp.float32)

    # Deterministic Conv2d-style init: uniform(-1/sqrt(fan_in), 1/sqrt(fan_in)).
    fan_in = Cin * 3 * 3
    bound = 1.0 / math.sqrt(fan_in)
    w = jax.random.uniform(kw, (Cout, Cin, 3, 3), jnp.float32, -bound, bound)
    b = jax.random.uniform(kb, (Cout,), jnp.float32, -bound, bound)

    t = 0.37  # non-zero so sin(2*pi*f*t) != 0 and the full pipeline is exercised

    out = tfnp_forward(x, w, b, t)
    out = jax.block_until_ready(out)

    ref = _reference(x, w, b, t)
    assert out.shape == (B, Cout, H, W)
    max_err = float(jnp.max(jnp.abs(out - ref)))
    # MXU f32 matmul uses multi-pass bf16 accumulation; allow a modest tolerance
    # versus the HIGHEST-precision XLA conv reference.
    assert jnp.allclose(out, ref, rtol=5e-3, atol=5e-3), f"max_err={max_err}"

    print("KERNEL_OK")
</pallas_src>

<mosaic_0001>
module attributes {stable_mosaic.version = 11 : i64} {
  func.func @kernel(%arg0: i32, %arg1: memref<1x4x512xf32, #tpu.memory_space<vmem>>, %arg2: memref<9x512xf32, #tpu.memory_space<vmem>>, %arg3: memref<8x40xf32, #tpu.memory_space<vmem>>, %arg4: memref<1x8x512xf32, #tpu.memory_space<vmem>>, %arg5: memref<40x512xf32, #tpu.memory_space<vmem>>) attributes {dimension_semantics = [#tpu.dimension_semantics<parallel>], iteration_bounds = array<i64: 1>, scalar_prefetch = 0 : i64, scratch_operands = 1 : i64, tpu.core_type = #tpu.core_type<tc>, window_params = [{transform_indices = @transform_0, window_bounds = array<i64: 1, 4, 512>}, {pipeline_mode = #tpu.pipeline_mode<synchronous>, transform_indices = @transform_1, window_bounds = array<i64: 9, 512>}, {pipeline_mode = #tpu.pipeline_mode<synchronous>, transform_indices = @transform_2, window_bounds = array<i64: 8, 40>}, {transform_indices = @transform_3, window_bounds = array<i64: 1, 8, 512>}]} {
    %c0 = arith.constant 0 : index
    %c0_0 = arith.constant 0 : index
    %c0_1 = arith.constant 0 : index
    %0 = vector.load %arg1[%c0, %c0_0, %c0_1] : memref<1x4x512xf32, #tpu.memory_space<vmem>>, vector<1x4x512xf32>
    %1 = vector.shape_cast %0 : vector<1x4x512xf32> to vector<4x512xf32>
    %cst = arith.constant 1.000000e+00 : f32
    %2 = vector.broadcast %cst : f32 to vector<1x512xf32>
    %c36 = arith.constant 36 : index
    %c0_2 = arith.constant 0 : index
    %3 = vector.load %arg5[%c36, %c0_2] : memref<40x512xf32, #tpu.memory_space<vmem>>, vector<1x512xf32>
    tpu.vector_store %arg5[%c36, %c0_2], %2 {strides = array<i32>} : memref<40x512xf32, #tpu.memory_space<vmem>>, vector<1x512xf32>,
    %cst_3 = arith.constant 0.000000e+00 : f32
    %4 = vector.broadcast %cst_3 : f32 to vector<3x512xf32>
    %c37 = arith.constant 37 : index
    %c0_4 = arith.constant 0 : index
    %5 = vector.load %arg5[%c37, %c0_4] : memref<40x512xf32, #tpu.memory_space<vmem>>, vector<3x512xf32>
    tpu.vector_store %arg5[%c37, %c0_4], %4 {strides = array<i32>} : memref<40x512xf32, #tpu.memory_space<vmem>>, vector<3x512xf32>,
    %c17_i32 = arith.constant 17 : i32
    %6 = tpu.dynamic_rotate %1 by %c17_i32 dim 1 : vector<4x512xf32>, i32 -> vector<4x512xf32>
    %c0_5 = arith.constant 0 : index
    %c0_6 = arith.constant 0 : index
    %7 = vector.load %arg2[%c0_5, %c0_6] : memref<9x512xf32, #tpu.memory_space<vmem>>, vector<1x512xf32>
    %8 = vector.broadcast %7 : vector<1x512xf32> to vector<4x512xf32>
    %9 = arith.mulf %6, %8 : vector<4x512xf32>
    %c0_7 = arith.constant 0 : index
    %c0_8 = arith.constant 0 : index
    %10 = vector.load %arg5[%c0_7, %c0_8] : memref<40x512xf32, #tpu.memory_space<vmem>>, vector<4x512xf32>
    tpu.vector_store %arg5[%c0_7, %c0_8], %9 {strides = array<i32>} : memref<40x512xf32, #tpu.memory_space<vmem>>, vector<4x512xf32>,
    %c16_i32 = arith.constant 16 : i32
    %11 = tpu.dynamic_rotate %1 by %c16_i32 dim 1 : vector<4x512xf32>, i32 -> vector<4x512xf32>
    %c1 = arith.constant 1 : index
    %c0_9 = arith.constant 0 : index
    %12 = vector.load %arg2[%c1, %c0_9] : memref<9x512xf32, #tpu.memory_space<vmem>>, vector<1x512xf32>
    %13 = vector.broadcast %12 : vector<1x512xf32> to vector<4x512xf32>
    %14 = arith.mulf %11, %13 : vector<4x512xf32>
    %c4 = arith.constant 4 : index
    %c0_10 = arith.constant 0 : index
    %15 = vector.load %arg5[%c4, %c0_10] : memref<40x512xf32, #tpu.memory_space<vmem>>, vector<4x512xf32>
    tpu.vector_store %arg5[%c4, %c0_10], %14 {strides = array<i32>} : memref<40x512xf32, #tpu.memory_space<vmem>>, vector<4x512xf32>,
    %c15_i32 = arith.constant 15 : i32
    %16 = tpu.dynamic_rotate %1 by %c15_i32 dim 1 : vector<4x512xf32>, i32 -> vector<4x512xf32>
    %c2 = arith.constant 2 : index
    %c0_11 = arith.constant 0 : index
    %17 = vector.load %arg2[%c2, %c0_11] : memref<9x512xf32, #tpu.memory_space<vmem>>, vector<1x512xf32>
    %18 = vector.broadcast %17 : vector<1x512xf32> to vector<4x512xf32>
    %19 = arith.mulf %16, %18 : vector<4x512xf32>
    %c8 = arith.constant 8 : index
    %c0_12 = arith.constant 0 : index
    %20 = vector.load %arg5[%c8, %c0_12] : memref<40x512xf32, #tpu.memory_space<vmem>>, vector<4x512xf32>
    tpu.vector_store %arg5[%c8, %c0_12], %19 {strides = array<i32>} : memref<40x512xf32, #tpu.memory_space<vmem>>, vector<4x512xf32>,
    %c1_i32 = arith.constant 1 : i32
    %21 = tpu.dynamic_rotate %1 by %c1_i32 dim 1 : vector<4x512xf32>, i32 -> vector<4x512xf32>
    %c3 = arith.constant 3 : index
    %c0_13 = arith.constant 0 : index
    %22 = vector.load %arg2[%c3, %c0_13] : memref<9x512xf32, #tpu.memory_space<vmem>>, vector<1x512xf32>
    %23 = vector.broadcast %22 : vector<1x512xf32> to vector<4x512xf32>
    %24 = arith.mulf %21, %23 : vector<4x512xf32>
    %c12 = arith.constant 12 : index
    %c0_14 = arith.constant 0 : index
    %25 = vector.load %arg5[%c12, %c0_14] : memref<40x512xf32, #tpu.memory_space<vmem>>, vector<4x512xf32>
    tpu.vector_store %arg5[%c12, %c0_14], %24 {strides = array<i32>} : memref<40x512xf32, #tpu.memory_space<vmem>>, vector<4x512xf32>,
    %c4_15 = arith.constant 4 : index
    %c0_16 = arith.constant 0 : index
    %26 = vector.load %arg2[%c4_15, %c0_16] : memref<9x512xf32, #tpu.memory_space<vmem>>, vector<1x512xf32>
    %27 = vector.broadcast %26 : vector<1x512xf32> to vector<4x512xf32>
    %28 = arith.mulf %1, %27 : vector<4x512xf32>
    %c16 = arith.constant 16 : index
    %c0_17 = arith.constant 0 : index
    %29 = vector.load %arg5[%c16, %c0_17] : memref<40x512xf32, #tpu.memory_space<vmem>>, vector<4x512xf32>
    tpu.vector_store %arg5[%c16, %c0_17], %28 {strides = array<i32>} : memref<40x512xf32, #tpu.memory_space<vmem>>, vector<4x512xf32>,
    %c511_i32 = arith.constant 511 : i32
    %30 = tpu.dynamic_rotate %1 by %c511_i32 dim 1 : vector<4x512xf32>, i32 -> vector<4x512xf32>
    %c5 = arith.constant 5 : index
    %c0_18 = arith.constant 0 : index
    %31 = vector.load %arg2[%c5, %c0_18] : memref<9x512xf32, #tpu.memory_space<vmem>>, vector<1x512xf32>
    %32 = vector.broadcast %31 : vector<1x512xf32> to vector<4x512xf32>
    %33 = arith.mulf %30, %32 : vector<4x512xf32>
    %c20 = arith.constant 20 : index
    %c0_19 = arith.constant 0 : index
    %34 = vector.load %arg5[%c20, %c0_19] : memref<40x512xf32, #tpu.memory_space<vmem>>, vector<4x512xf32>
    tpu.vector_store %arg5[%c20, %c0_19], %33 {strides = array<i32>} : memref<40x512xf32, #tpu.memory_space<vmem>>, vector<4x512xf32>,
    %c497_i32 = arith.constant 497 : i32
    %35 = tpu.dynamic_rotate %1 by %c497_i32 dim 1 : vector<4x512xf32>, i32 -> vector<4x512xf32>
    %c6 = arith.constant 6 : index
    %c0_20 = arith.constant 0 : index
    %36 = vector.load %arg2[%c6, %c0_20] : memref<9x512xf32, #tpu.memory_space<vmem>>, vector<1x512xf32>
    %37 = vector.broadcast %36 : vector<1x512xf32> to vector<4x512xf32>
    %38 = arith.mulf %35, %37 : vector<4x512xf32>
    %c24 = arith.constant 24 : index
    %c0_21 = arith.constant 0 : index
    %39 = vector.load %arg5[%c24, %c0_21] : memref<40x512xf32, #tpu.memory_space<vmem>>, vector<4x512xf32>
    tpu.vector_store %arg5[%c24, %c0_21], %38 {strides = array<i32>} : memref<40x512xf32, #tpu.memory_space<vmem>>, vector<4x512xf32>,
    %c496_i32 = arith.constant 496 : i32
    %40 = tpu.dynamic_rotate %1 by %c496_i32 dim 1 : vector<4x512xf32>, i32 -> vector<4x512xf32>
    %c7 = arith.constant 7 : index
    %c0_22 = arith.constant 0 : index
    %41 = vector.load %arg2[%c7, %c0_22] : memref<9x512xf32, #tpu.memory_space<vmem>>, vector<1x512xf32>
    %42 = vector.broadcast %41 : vector<1x512xf32> to vector<4x512xf32>
    %43 = arith.mulf %40, %42 : vector<4x512xf32>
    %c28 = arith.constant 28 : index
    %c0_23 = arith.constant 0 : index
    %44 = vector.load %arg5[%c28, %c0_23] : memref<40x512xf32, #tpu.memory_space<vmem>>, vector<4x512xf32>
    tpu.vector_store %arg5[%c28, %c0_23], %43 {strides = array<i32>} : memref<40x512xf32, #tpu.memory_space<vmem>>, vector<4x512xf32>,
    %c495_i32 = arith.constant 495 : i32
    %45 = tpu.dynamic_rotate %1 by %c495_i32 dim 1 : vector<4x512xf32>, i32 -> vector<4x512xf32>
    %c8_24 = arith.constant 8 : index
    %c0_25 = arith.constant 0 : index
    %46 = vector.load %arg2[%c8_24, %c0_25] : memref<9x512xf32, #tpu.memory_space<vmem>>, vector<1x512xf32>
    %47 = vector.broadcast %46 : vector<1x512xf32> to vector<4x512xf32>
    %48 = arith.mulf %45, %47 : vector<4x512xf32>
    %c32 = arith.constant 32 : index
    %c0_26 = arith.constant 0 : index
    %49 = vector.load %arg5[%c32, %c0_26] : memref<40x512xf32, #tpu.memory_space<vmem>>, vector<4x512xf32>
    tpu.vector_store %arg5[%c32, %c0_26], %48 {strides = array<i32>} : memref<40x512xf32, #tpu.memory_space<vmem>>, vector<4x512xf32>,
    %c0_27 = arith.constant 0 : index
    %c0_28 = arith.constant 0 : index
    %50 = vector.load %arg3[%c0_27, %c0_28] : memref<8x40xf32, #tpu.memory_space<vmem>>, vector<8x40xf32>
    %c0_29 = arith.constant 0 : index
    %c0_30 = arith.constant 0 : index
    %51 = vector.load %arg5[%c0_29, %c0_30] : memref<40x512xf32, #tpu.memory_space<vmem>>, vector<40x512xf32>
    %cst_31 = arith.constant dense<0.000000e+00> : vector<8x512xf32>
    %52 = tpu.matmul %50, %51, %cst_31 {dimension_numbers = #tpu.dot_dimension_numbers<[1], [0], [0], [1], [0, 0, 1, 1], [], []>} : vector<8x40xf32>, vector<40x512xf32>, vector<8x512xf32> -> vector<8x512xf32>
    %c0_32 = arith.constant 0 : index
    %c0_33 = arith.constant 0 : index
    %c0_34 = arith.constant 0 : index
    %53 = vector.load %arg4[%c0_32, %c0_33, %c0_34] : memref<1x8x512xf32, #tpu.memory_space<vmem>>, vector<1x8x512xf32>
    %54 = vector.shape_cast %53 : vector<1x8x512xf32> to vector<8x512xf32>
    %55 = vector.shape_cast %52 : vector<8x512xf32> to vector<1x8x512xf32>
    tpu.vector_store %arg4[%c0_32, %c0_33, %c0_34], %55 {strides = array<i32>} : memref<1x8x512xf32, #tpu.memory_space<vmem>>, vector<1x8x512xf32>,
    return
  }
  func.func @transform_0(%arg0: i32) -> (i32, i32, i32) {
    %c0_i32 = arith.constant 0 : i32
    %c0_i32_0 = arith.constant 0 : i32
    %c0_i32_1 = arith.constant 0 : i32
    return %arg0, %c0_i32, %c0_i32_0 : i32, i32, i32
  }
  func.func @transform_1(%arg0: i32) -> (i32, i32) {
    %c0_i32 = arith.constant 0 : i32
    %c0_i32_0 = arith.constant 0 : i32
    %c0_i32_1 = arith.constant 0 : i32
    return %c0_i32, %c0_i32_0 : i32, i32
  }
  func.func @transform_2(%arg0: i32) -> (i32, i32) {
    %c0_i32 = arith.constant 0 : i32
    %c0_i32_0 = arith.constant 0 : i32
    %c0_i32_1 = arith.constant 0 : i32
    return %c0_i32, %c0_i32_0 : i32, i32
  }
  func.func @transform_3(%arg0: i32) -> (i32, i32, i32) {
    %c0_i32 = arith.constant 0 : i32
    %c0_i32_0 = arith.constant 0 : i32
    %c0_i32_1 = arith.constant 0 : i32
    return %arg0, %c0_i32, %c0_i32_0 : i32, i32, i32
  }
}

</mosaic_0001>

<bundles_post_ra>
// kernel: tpu_custom_call.1
= control target key start
LH: loop header
LB: loop body
LE: loop exit
PB: predicated region body
PF: predicated region fallthrough
CT: control target
= control target key end

     0   :  { %8 = vsyncpa [#allocation4], 0  ;;  %s1062_s0 = inlined_call_operand.hbm [shape: f32[1,4,512], index: 0, kind: input, shape index: {}]   ;;  %s1063_s1 = inlined_call_operand.hbm [shape: f32[9,512], index: 1, kind: input, shape index: {}]   ;;  %s1064_s2 = inlined_call_operand.hbm [shape: f32[8,40], index: 2, kind: input, shape index: {}]   ;;  %s1065_s3 = inlined_call_operand.hbm [shape: f32[1,8,512], index: 3, kind: output, shape index: {}]  }
   0x1   :  { %9 = vsyncpa [#allocation7], 0 }
   0x2   :  { %10 = vsyncpa [#allocation5], 0  ;;  %s824_s12 = smov [#allocation6]   ;;  %s730_s16 = scalar_lea.hbm %s1063_s1, 1024 }
   0x3   :  { %s26_s13 = sshll.u32 %s824_s12, 4  ;;  %p731_p0 = scmp.ne.s32.totalorder %s1063_s1, %s730_s16  ;;  %s27_s13 = int_to_ptr.vmem [resolvable:$true] %s26_s13 }
   0x4   :  { %p734_p1 = scmp.lt.u32.totalorder %s730_s16, %s1063_s1 }
   0x6   :  { %p736_p2 = pnand %p734_p1, %p731_p0 }
   0x8   :  { %739 = shalt.err (!%p736_p2)
}
   0x9   :  { %s740_s21 = scalar_lea.vmem %s27_s13, 1024  ;;  %p745_p4 = scmp.lt.s32.totalorder %s27_s13, %s27_s13 }
   0xa   :  { %p741_p3 = scmp.ne.s32.totalorder %s27_s13, %s740_s21  ;;  %p746_p5 = scmp.lt.s32.totalorder %s740_s21, %s740_s21 }
   0xc   :  { %p747_p6 = por %p746_p5, %p745_p4 }
   0xe   :  { %p748_p7 = pnand %p747_p6, %p741_p3 }
  0x10   :  { %751 = shalt.err (!%p748_p7)
}
  0x11   :  { %s825_s22 = smov 512   ;;  %s826_s23 = smov 32  }
  0x12   :  { %32 = dma.hbm_to_vmem [thread:$0]  %s1063_s1, 1024, %s27_s13, [#allocation7], %s825_s22, %s825_s22, %s826_s23  }
  0x13   :  { %s827_s26 = smov [#allocation3]   ;;  %s828_s28 = smov [#allocation8]  }
  0x14   :  { %s17_s27 = sshll.u32 %s827_s26, 4  ;;  %s39_s29 = sshll.u32 %s828_s28, 4  ;;  %s18_s27 = int_to_ptr.vmem [resolvable:$true] %s17_s27  ;;  %s40_s29 = int_to_ptr.vmem [resolvable:$true] %s39_s29 }
  0x15   :  { %s752_s5 = scalar_lea.hbm %s1062_s0, 256 }
  0x16   :  { %p753_p8 = scmp.ne.s32.totalorder %s1062_s0, %s752_s5  ;;  %p756_p9 = scmp.lt.u32.totalorder %s752_s5, %s1062_s0 }
  0x18   :  { %p758_p10 = pnand %p756_p9, %p753_p8 }
  0x1a   :  { %761 = shalt.err (!%p758_p10)
}
  0x1b   :  { %s762_s1 = scalar_lea.vmem %s18_s27, 256  ;;  %p767_p12 = scmp.lt.s32.totalorder %s18_s27, %s18_s27 }
  0x1c   :  { %p763_p11 = scmp.ne.s32.totalorder %s18_s27, %s762_s1  ;;  %p768_p13 = scmp.lt.s32.totalorder %s762_s1, %s762_s1 }
  0x1e   :  { %p769_p0 = por %p768_p13, %p767_p12 }
  0x20   :  { %p770_p1 = pnand %p769_p0, %p763_p11 }
  0x22   :  { %773 = shalt.err (!%p770_p1)
}
  0x23   :  { %20 = dma.hbm_to_vmem [thread:$0]  %s1062_s0, 256, %s18_s27, [#allocation4]  }
  0x24   :  { %s774_s14 = scalar_lea.hbm %s1064_s2, 128 }
  0x25   :  { %p775_p2 = scmp.ne.s32.totalorder %s1064_s2, %s774_s14  ;;  %p778_p3 = scmp.lt.u32.totalorder %s774_s14, %s1064_s2 }
  0x27   :  { %p780_p4 = pnand %p778_p3, %p775_p2 }
  0x29   :  { %783 = shalt.err (!%p780_p4)
}
  0x2a   :  { %s784_s19 = scalar_lea.vmem %s40_s29, 128  ;;  %p789_p6 = scmp.lt.s32.totalorder %s40_s29, %s40_s29 }
  0x2b   :  { %p785_p5 = scmp.ne.s32.totalorder %s40_s29, %s784_s19  ;;  %p790_p7 = scmp.lt.s32.totalorder %s784_s19, %s784_s19 }
  0x2d   :  { %p791_p8 = por %p790_p7, %p789_p6 }
  0x2f   :  { %p792_p9 = pnand %p791_p8, %p785_p5 }
  0x31   :  { %795 = shalt.err (!%p792_p9)
}
  0x32   :  { %42 = dma.hbm_to_vmem [thread:$0]  %s1064_s2, 128, %s40_s29, [#allocation7]  }
  0x33   :  { %818 = dma.done.wait [#allocation4], 256  }
  0x34   :  { %819 = vsyncadd [#allocation4], 4294967040 }
  0x35   :  { %820 = dma.done.wait [#allocation7], 1152  }
  0x36   :  { %821 = vsyncadd [#allocation7], 4294966144  ;;  %v896_v0 = vld [vmem:[#allocation3 + $0x8] sm:$0xff]  ;;  %v898_v1 = vld [vmem:[#allocation3] sm:$0xff]  ;;  %s829_s21 = smov 16   ;;  %s830_s2 = smov 1   ;;  %v54_v4 = vlaneseq }
  0x37   :  { %120 = vrot.lane.b32.xlu1 %v896_v0, %s829_s21  ;;  %116 = vrot.lane.b32.xlu0 %v898_v1, %s829_s21  ;;  %v904_v2 = vcombine.high %v896_v0, %v896_v0  ;;  %v67_v3 = vcombine.high %v898_v1, %v898_v1  ;;  %s831_s22 = smov 17   ;;  %v273_v8 = vld [vmem:[#allocation6 + $0x4] ss:$8 sm:$0xf]  ;;  %s832_s23 = smov 15   ;;  %v835_v21 = vmov 1.0  }
  0x38   :  { %v89_v5 = vshrl.u32 %v54_v4, 7  ;;  %s833_s24 = smov 127   ;;  %s834_s25 = smov 112   ;;  %vm56_vm0 = vcmp.lt.s32.totalorder %v54_v4, 512  ;;  %v836_v22 = vmov 0.0   ;;  %v944_v23 = vand.u32 127, %v54_v4 }
  0x39   :  { %59 = vst.msk [vmem:[#allocation2 + $0x84] ss:$8 sm:$0xf] %vm56_vm0, %v835_v21  ;;  %62 = vst [vmem:[#allocation2 + $0x88] sm:$0xe0] %v836_v22  ;;  %596 = vmatprep.mubr.f32.mxu0 %v836_v22  ;;  %667 = vmatprep.mubr.f32.mxu1 %v836_v22  ;;  %s837_s26 = smov 113  }
  0x3a   :  { %v913_v6 = vsub.s32 0, %v89_v5  ;;  %v915_v7 = vsub.s32 1, %v89_v5  ;;  %v917_v9 = vsub.s32 3, %v89_v5  ;;  %v919_v10 = vsub.s32 2, %v89_v5  ;;  %61 = vst [vmem:[#allocation2 + $0x80] sm:$0xe0] %v836_v22 }
  0x3b   :  { %122 = vrot.lane.b32.xlu1 %v904_v2, %s829_s21  ;;  %216 = vrot.lane.b32.xlu0 %v898_v1, %s830_s2  ;;  %63 = vst [vmem:[#allocation2 + $0x90] sm:$0xe0] %v836_v22  ;;  %64 = vst [vmem:[#allocation2 + $0x98] sm:$0xe0] %v836_v22  ;;  %s838_s27 = smov 111   ;;  %vm124_vm1 = vcmp.lt.s32.totalorder %v944_v23, 16 }
  0x3c   :  { %v278_v11 = vrot.slane %v273_v8, %v913_v6  ;;  %v282_v12 = vrot.slane %v273_v8, %v915_v7  ;;  %v286_v14 = vrot.slane %v273_v8, %v919_v10  ;;  %v290_v15 = vrot.slane %v273_v8, %v917_v9  ;;  %v130_v24 = vld [vmem:[#allocation6 + $0x1] ss:$8 sm:$0xf]  ;;  %v230_v29 = vld [vmem:[#allocation6 + $0x3] ss:$8 sm:$0xf] }
  0x3d   :  { %v135_v27 = vrot.slane %v130_v24, %v913_v6  ;;  %v147_v28 = vrot.slane %v130_v24, %v917_v9  ;;  %vm224_vm2 = vcmp.lt.s32.totalorder %v944_v23, 1  ;;  %v239_v34 = vrot.slane %v230_v29, %v915_v7  ;;  %v86_v52 = vld [vmem:[#allocation6] ss:$8 sm:$0xf]  ;;  %s839_s28 = smov [#allocation9]  }
  0x3e   :  { %v291_v13 = vcombine.low %v278_v11, %v282_v12  ;;  %v292_v17 = vcombine.low %v286_v14, %v290_v15  ;;  %v139_v37 = vrot.slane %v130_v24, %v915_v7  ;;  %v143_v38 = vrot.slane %v130_v24, %v919_v10  ;;  %v186_v15 = vld [vmem:[#allocation6 + $0x2] ss:$8 sm:$0xf]  ;;  %s684_s29 = sshll.u32 %s839_s28, 4  ;;  %s685_s29 = int_to_ptr.vmem [resolvable:$true] %s684_s29 }
  0x3f   :  { %218 = vrot.lane.b32.xlu1 %v67_v3, %s830_s2  ;;  %118 = vrot.lane.b32.xlu0 %v67_v3, %s829_s21  ;;  %v235_v43 = vrot.slane %v230_v29, %v913_v6  ;;  %v243_v47 = vrot.slane %v230_v29, %v919_v10  ;;  %v247_v51 = vrot.slane %v230_v29, %v917_v9  ;;  %vm81_vm3 = vcmp.lt.s32.totalorder %v944_v23, 17  ;;  %s796_s30 = scalar_lea.vmem %s685_s29, 512  ;;  %p801_p11 = scmp.lt.s32.totalorder %s685_s29, %s685_s29 }
  0x40   :  { %v295_v16 = vmul.f32 %v291_v13, %v898_v1  ;;  %v296_v18 = vmul.f32 %v292_v17, %v896_v0  ;;  %v91_v12 = vrot.slane %v86_v52, %v913_v6  ;;  %v99_v13 = vrot.slane %v86_v52, %v919_v10  ;;  %p797_p10 = scmp.ne.s32.totalorder %s685_s29, %s796_s30  ;;  %p802_p12 = scmp.lt.s32.totalorder %s796_s30, %s796_s30 }
  0x41   :  { %v103_v14 = vrot.slane %v86_v52, %v917_v9  ;;  %vm180_vm4 = vcmp.lt.s32.totalorder %v944_v23, 15  ;;  %vm315_vm5 = vcmp.lt.s32.totalorder %v944_v23, 127  ;;  %vm415_vm6 = vcmp.lt.s32.totalorder %v944_v23, 112 }
  0x42   :  { %303 = vst [vmem:[#allocation2 + $0x40] sm:$0xf] %v295_v16  ;;  %v299_v19 = vcombine.high %v295_v16, %v295_v16  ;;  %v300_v20 = vcombine.high %v296_v18, %v296_v18  ;;  %305 = vst [vmem:[#allocation2 + $0x50] sm:$0xf] %v296_v18  ;;  %vm371_vm7 = vcmp.lt.s32.totalorder %v944_v23, 113  ;;  %vm471_vm8 = vcmp.lt.s32.totalorder %v944_v23, 111  ;;  %p803_p13 = por %p802_p12, %p801_p11 }
  0x43   :  { %222 = vrot.lane.b32.xlu1 %v904_v2, %s830_s2  ;;  %220 = vrot.lane.b32.xlu0 %v896_v0, %s830_s2  ;;  %v507_v23 = vld [vmem:[#allocation8] sm:$0xff]  ;;  %vm528_vm9 = vcmask 326656  }
  0x44   :  { %304 = vst [vmem:[#allocation2 + $0x48] sm:$0xf] %v299_v19  ;;  %306 = vst [vmem:[#allocation2 + $0x58] sm:$0xf] %v300_v20  ;;  %p804_p0 = pnand %p803_p13, %p797_p10 }
  0x47   :  { %73 = vrot.lane.b32.xlu1 %v67_v3, %s831_s22  ;;  %71 = vrot.lane.b32.xlu0 %v898_v1, %s831_s22 }
  0x4b   :  { %77 = vrot.lane.b32.xlu1 %v904_v2, %s831_s22  ;;  %75 = vrot.lane.b32.xlu0 %v896_v0, %s831_s22 }
  0x4f   :  { %174 = vrot.lane.b32.xlu1 %v67_v3, %s832_s23  ;;  %172 = vrot.lane.b32.xlu0 %v898_v1, %s832_s23 }
  0x53   :  { %178 = vrot.lane.b32.xlu1 %v904_v2, %s832_s23  ;;  %176 = vrot.lane.b32.xlu0 %v896_v0, %s832_s23 }
  0x57   :  { %309 = vrot.lane.b32.xlu1 %v67_v3, %s833_s24  ;;  %307 = vrot.lane.b32.xlu0 %v898_v1, %s833_s24 }
  0x5b   :  { %313 = vrot.lane.b32.xlu1 %v904_v2, %s833_s24  ;;  %311 = vrot.lane.b32.xlu0 %v896_v0, %s833_s24 }
  0x5f   :  { %409 = vrot.lane.b32.xlu1 %v67_v3, %s834_s25  ;;  %407 = vrot.lane.b32.xlu0 %v898_v1, %s834_s25 }
  0x63   :  { %413 = vrot.lane.b32.xlu1 %v904_v2, %s834_s25  ;;  %411 = vrot.lane.b32.xlu0 %v896_v0, %s834_s25 }
  0x67   :  { %365 = vrot.lane.b32.xlu1 %v67_v3, %s837_s26  ;;  %363 = vrot.lane.b32.xlu0 %v898_v1, %s837_s26 }
  0x6b   :  { %369 = vrot.lane.b32.xlu1 %v904_v2, %s837_s26  ;;  %367 = vrot.lane.b32.xlu0 %v896_v0, %s837_s26 }
  0x6f   :  { %465 = vrot.lane.b32.xlu1 %v67_v3, %s838_s27  ;;  %463 = vrot.lane.b32.xlu0 %v898_v1, %s838_s27 }
  0x73   :  { %469 = vrot.lane.b32.xlu1 %v904_v2, %s838_s27  ;;  %467 = vrot.lane.b32.xlu0 %v896_v0, %s838_s27  ;;  %v95_v0 = vrot.slane %v86_v52, %v915_v7  ;;  %v421_v52 = vld [vmem:[#allocation6 + $0x7] ss:$8 sm:$0xf] }
  0xa9   :  { %v121_v25 = vpop.permute.xlu1 %120  ;;  %v117_v26 = vpop.permute.xlu0 %116 }
  0xad   :  { %v123_v30 = vpop.permute.xlu1 %122  ;;  %v217_v31 = vpop.permute.xlu0 %216 }
  0xae   :  { %v125_v32 = vsel %vm124_vm1, %v121_v25, %v123_v30  ;;  %v128_v33 = vsel %vm124_vm1, %v123_v30, %v117_v26  ;;  %v191_v30 = vrot.slane %v186_v15, %v913_v6 }
  0xaf   :  { %v152_v35 = vmul.f32 %v135_v27, %v128_v33  ;;  %v155_v36 = vmul.f32 %v147_v28, %v125_v32  ;;  %v203_v32 = vrot.slane %v186_v15, %v917_v9  ;;  %v321_v33 = vld [vmem:[#allocation6 + $0x5] ss:$8 sm:$0xf] }
  0xb1   :  { %v160_v39 = vrot.slane %v152_v35, 4  ;;  %v163_v40 = vrot.slane %v155_v36, 4  ;;  %v219_v41 = vpop.permute.xlu1 %218  ;;  %v119_v42 = vpop.permute.xlu0 %118 }
  0xb2   :  { %v227_v44 = vsel %vm224_vm2, %v217_v31, %v219_v41  ;;  %v126_v45 = vsel %vm124_vm1, %v119_v42, %v121_v25  ;;  %v127_v46 = vsel %vm124_vm1, %v117_v26, %v119_v42  ;;  %v195_v25 = vrot.slane %v186_v15, %v915_v7 }
  0xb3   :  { %168 = vst [vmem:[#allocation2] sm:$0xf0] %v160_v39  ;;  %171 = vst [vmem:[#allocation2 + $0x18] sm:$0xf0] %v163_v40  ;;  %v253_v48 = vmul.f32 %v239_v34, %v227_v44  ;;  %v153_v49 = vmul.f32 %v139_v37, %v127_v46  ;;  %v154_v50 = vmul.f32 %v143_v38, %v126_v45 }
  0xb4   :  { %v326_v42 = vrot.slane %v321_v33, %v913_v6 }
  0xb5   :  { %v261_v53 = vrot.slane %v253_v48, 4  ;;  %v161_v54 = vrot.slane %v153_v49, 4  ;;  %v162_v55 = vrot.slane %v154_v50, 4  ;;  %v223_v56 = vpop.permute.xlu1 %222  ;;  %v221_v57 = vpop.permute.xlu0 %220  ;;  %v330_v48 = vrot.slane %v321_v33, %v915_v7 }
  0xb6   :  { %v228_v58 = vsel %vm224_vm2, %v223_v56, %v217_v31  ;;  %v225_v59 = vsel %vm224_vm2, %v221_v57, %v223_v56  ;;  %v226_v60 = vsel %vm224_vm2, %v219_v41, %v221_v57  ;;  %v199_v31 = vrot.slane %v186_v15, %v919_v10 }
  0xb7   :  { %269 = vst [vmem:[#allocation2 + $0x28] sm:$0xf0] %v261_v53  ;;  %169 = vst [vmem:[#allocation2 + $0x8] sm:$0xf0] %v161_v54  ;;  %v252_v61 = vmul.f32 %v235_v43, %v228_v58  ;;  %v254_v62 = vmul.f32 %v243_v47, %v226_v60  ;;  %v255_v63 = vmul.f32 %v247_v51, %v225_v59 }
  0xb8   :  { %170 = vst [vmem:[#allocation2 + $0x10] sm:$0xf0] %v162_v55  ;;  %v338_v47 = vrot.slane %v321_v33, %v917_v9  ;;  %v334_v49 = vrot.slane %v321_v33, %v919_v10 }
  0xb9   :  { %v260_v1 = vrot.slane %v252_v61, 4  ;;  %v262_v2 = vrot.slane %v254_v62, 4  ;;  %v263_v3 = vrot.slane %v255_v63, 4  ;;  %v74_v4 = vpop.permute.xlu1 %73  ;;  %v72_v5 = vpop.permute.xlu0 %71  ;;  %v426_v63 = vrot.slane %v421_v52, %v913_v6 }
  0xba   :  { %v84_v8 = vsel %vm81_vm3, %v72_v5, %v74_v4 }
  0xbb   :  { %268 = vst [vmem:[#allocation2 + $0x20] sm:$0xf0] %v260_v1  ;;  %270 = vst [vmem:[#allocation2 + $0x30] sm:$0xf0] %v262_v2  ;;  %v109_v11 = vmul.f32 %v95_v0, %v84_v8 }
  0xbc   :  { %271 = vst [vmem:[#allocation2 + $0x38] sm:$0xf0] %v263_v3 }
  0xbd   :  { %113 = vst [vmem:[#allocation2 + $0x8] sm:$0xf] %v109_v11  ;;  %v78_v16 = vpop.permute.xlu1 %77  ;;  %v76_v17 = vpop.permute.xlu0 %75 }
  0xbe   :  { %v85_v18 = vsel %vm81_vm3, %v78_v16, %v72_v5  ;;  %v82_v19 = vsel %vm81_vm3, %v76_v17, %v78_v16  ;;  %v83_v20 = vsel %vm81_vm3, %v74_v4, %v76_v17 }
  0xbf   :  { %v108_v21 = vmul.f32 %v91_v12, %v85_v18  ;;  %v110_v22 = vmul.f32 %v99_v13, %v83_v20  ;;  %v111_v24 = vmul.f32 %v103_v14, %v82_v19  ;;  %v438_v20 = vrot.slane %v421_v52, %v917_v9 }
  0xc1   :  { %112 = vst [vmem:[#allocation2] sm:$0xf] %v108_v21  ;;  %114 = vst [vmem:[#allocation2 + $0x10] sm:$0xf] %v110_v22  ;;  %v175_v26 = vpop.permute.xlu1 %174  ;;  %v173_v27 = vpop.permute.xlu0 %172  ;;  %v430_v21 = vrot.slane %v421_v52, %v915_v7  ;;  %v434_v22 = vrot.slane %v421_v52, %v919_v10 }
  0xc2   :  { %115 = vst [vmem:[#allocation2 + $0x18] sm:$0xf] %v111_v24  ;;  %v183_v28 = vsel %vm180_vm4, %v173_v27, %v175_v26  ;;  %v377_v24 = vld [vmem:[#allocation6 + $0x6] ss:$8 sm:$0xf] }
  0xc3   :  { %v209_v29 = vmul.f32 %v195_v25, %v183_v28 }
  0xc4   :  { %v509_v50 = vld [vmem:[#allocation2 + $0x8] sm:$0xff] }
  0xc5   :  { %213 = vst [vmem:[#allocation2 + $0x28] sm:$0xf] %v209_v29  ;;  %v179_v34 = vpop.permute.xlu1 %178  ;;  %v177_v35 = vpop.permute.xlu0 %176 }
  0xc6   :  { %v184_v36 = vsel %vm180_vm4, %v179_v34, %v173_v27  ;;  %v181_v37 = vsel %vm180_vm4, %v177_v35, %v179_v34  ;;  %v182_v38 = vsel %vm180_vm4, %v175_v26, %v177_v35  ;;  %v382_v34 = vrot.slane %v377_v24, %v913_v6 }
  0xc7   :  { %v208_v39 = vmul.f32 %v191_v30, %v184_v36  ;;  %v210_v40 = vmul.f32 %v199_v31, %v182_v38  ;;  %v211_v41 = vmul.f32 %v203_v32, %v181_v37 }
  0xc8   :  { %v508_v0 = vld [vmem:[#allocation2] sm:$0xff]  ;;  %v510_v15 = vld [vmem:[#allocation2 + $0x10] sm:$0xff] }
  0xc9   :  { %212 = vst [vmem:[#allocation2 + $0x20] sm:$0xf] %v208_v39  ;;  %214 = vst [vmem:[#allocation2 + $0x30] sm:$0xf] %v210_v40  ;;  %v310_v43 = vpop.permute.xlu1 %309  ;;  %v308_v44 = vpop.permute.xlu0 %307  ;;  %v511_v14 = vld [vmem:[#allocation2 + $0x18] sm:$0xff] }
  0xca   :  { %215 = vst [vmem:[#allocation2 + $0x38] sm:$0xf] %v211_v41  ;;  %v318_v45 = vsel %vm315_vm5, %v308_v44, %v310_v43 }
  0xcb   :  { %v343_v46 = vmul.f32 %v326_v42, %v318_v45  ;;  %v394_v42 = vrot.slane %v377_v24, %v917_v9  ;;  %v477_v45 = vld [vmem:[#allocation6 + $0x20] ss:$8 sm:$0xf] }
  0xcc   :  { %v513_v51 = vld [vmem:[#allocation2 + $0x28] sm:$0xff] }
  0xcd   :  { %v351_v53 = vrot.slane %v343_v46, 4  ;;  %v314_v54 = vpop.permute.xlu1 %313  ;;  %v312_v55 = vpop.permute.xlu0 %311  ;;  %v696_v56 = vpack.c.bf16 %v513_v51, %v509_v50 }
  0xce   :  { %v319_v57 = vsel %vm315_vm5, %v314_v54, %v308_v44  ;;  %v316_v58 = vsel %vm315_vm5, %v312_v55, %v314_v54  ;;  %v317_v59 = vsel %vm315_vm5, %v310_v43, %v312_v55  ;;  %v386_v43 = vrot.slane %v377_v24, %v915_v7 }
  0xcf   :  { %359 = vst [vmem:[#allocation2 + $0x40] sm:$0xf0] %v351_v53  ;;  %v346_v60 = vmul.f32 %v338_v47, %v319_v57  ;;  %v344_v61 = vmul.f32 %v330_v48, %v317_v59  ;;  %v345_v62 = vmul.f32 %v334_v49, %v316_v58  ;;  %697 = vmatprep.subr.bf16.mxu0 %v696_v56 }
  0xd0   :  { %v512_v1 = vld [vmem:[#allocation2 + $0x20] sm:$0xff]  ;;  %v514_v3 = vld [vmem:[#allocation2 + $0x30] sm:$0xff]  ;;  %v390_v44 = vrot.slane %v377_v24, %v919_v10  ;;  %v482_v54 = vrot.slane %v477_v45, %v913_v6  ;;  %v494_v59 = vrot.slane %v477_v45, %v917_v9 }
  0xd1   :  { %v515_v2 = vld [vmem:[#allocation2 + $0x38] sm:$0xff]  ;;  %v354_v4 = vrot.slane %v346_v60, 4  ;;  %v352_v5 = vrot.slane %v344_v61, 4  ;;  %v353_v8 = vrot.slane %v345_v62, 4  ;;  %v410_v11 = vpop.permute.xlu1 %409  ;;  %v408_v12 = vpop.permute.xlu0 %407  ;;  %v698_v13 = vpack.c.bf16 %v512_v1, %v508_v0 }
  0xd2   :  { %v418_v16 = vsel %vm415_vm6, %v408_v12, %v410_v11  ;;  %v704_v17 = vpack.c.bf16 %v515_v2, %v511_v14  ;;  %v706_v18 = vpack.c.bf16 %v514_v3, %v510_v15  ;;  %v486_v60 = vrot.slane %v477_v45, %v915_v7 }
  0xd3   :  { %362 = vst [vmem:[#allocation2 + $0x58] sm:$0xf0] %v354_v4  ;;  %360 = vst [vmem:[#allocation2 + $0x48] sm:$0xf0] %v352_v5  ;;  %v443_v19 = vmul.f32 %v426_v63, %v418_v16  ;;  %699 = vmatpush1.bf16.msra.mxu0 %v698_v13  ;;  %v490_v61 = vrot.slane %v477_v45, %v919_v10 }
  0xd4   :  { %361 = vst [vmem:[#allocation2 + $0x50] sm:$0xf0] %v353_v8  ;;  %705 = vmatprep.subr.bf16.mxu1 %v704_v17 }
  0xd5   :  { %v451_v25 = vrot.slane %v443_v19, 4  ;;  %707 = vmatpush1.bf16.msra.mxu1 %v706_v18  ;;  %v414_v26 = vpop.permute.xlu1 %413  ;;  %v412_v27 = vpop.permute.xlu0 %411 }
  0xd6   :  { %v419_v28 = vsel %vm415_vm6, %v414_v26, %v408_v12  ;;  %v416_v29 = vsel %vm415_vm6, %v412_v27, %v414_v26  ;;  %v417_v30 = vsel %vm415_vm6, %v410_v11, %v412_v27  ;;  %v516_v15 = vld [vmem:[#allocation2 + $0x40] sm:$0xff] }
  0xd7   :  { %459 = vst [vmem:[#allocation2 + $0x60] sm:$0xf0] %v451_v25  ;;  %v446_v31 = vmul.f32 %v438_v20, %v419_v28  ;;  %v444_v32 = vmul.f32 %v430_v21, %v417_v30  ;;  %v445_v33 = vmul.f32 %v434_v22, %v416_v29 }
  0xd9   :  { %v454_v35 = vrot.slane %v446_v31, 4  ;;  %v452_v36 = vrot.slane %v444_v32, 4  ;;  %v453_v37 = vrot.slane %v445_v33, 4  ;;  %v366_v38 = vpop.permute.xlu1 %365  ;;  %v364_v39 = vpop.permute.xlu0 %363 }
  0xda   :  { %v374_v40 = vsel %vm371_vm7, %v364_v39, %v366_v38  ;;  %v517_v2 = vld [vmem:[#allocation2 + $0x48] sm:$0xff]  ;;  %v519_v5 = vld [vmem:[#allocation2 + $0x58] sm:$0xff] }
  0xdb   :  { %462 = vst [vmem:[#allocation2 + $0x78] sm:$0xf0] %v454_v35  ;;  %460 = vst [vmem:[#allocation2 + $0x68] sm:$0xf0] %v452_v36  ;;  %v399_v41 = vmul.f32 %v382_v34, %v374_v40  ;;  %v518_v8 = vld [vmem:[#allocation2 + $0x50] sm:$0xff] }
  0xdc   :  { %461 = vst [vmem:[#allocation2 + $0x70] sm:$0xf0] %v453_v37 }
  0xdd   :  { %403 = vst [vmem:[#allocation2 + $0x60] sm:$0xf] %v399_v41  ;;  %v370_v46 = vpop.permute.xlu1 %369  ;;  %v368_v47 = vpop.permute.xlu0 %367 }
  0xde   :  { %v375_v48 = vsel %vm371_vm7, %v370_v46, %v364_v39  ;;  %v372_v49 = vsel %vm371_vm7, %v368_v47, %v370_v46  ;;  %v373_v50 = vsel %vm371_vm7, %v366_v38, %v368_v47 }
  0xdf   :  { %v402_v51 = vmul.f32 %v394_v42, %v375_v48  ;;  %v400_v52 = vmul.f32 %v386_v43, %v373_v50  ;;  %v401_v53 = vmul.f32 %v390_v44, %v372_v49 }
  0xe1   :  { %406 = vst [vmem:[#allocation2 + $0x78] sm:$0xf] %v402_v51  ;;  %404 = vst [vmem:[#allocation2 + $0x68] sm:$0xf] %v400_v52  ;;  %v466_v55 = vpop.permute.xlu1 %465  ;;  %v464_v56 = vpop.permute.xlu0 %463 }
  0xe2   :  { %405 = vst [vmem:[#allocation2 + $0x70] sm:$0xf] %v401_v53  ;;  %v474_v57 = vsel %vm471_vm8, %v464_v56, %v466_v55 }
  0xe3   :  { %v499_v58 = vmul.f32 %v482_v54, %v474_v57 }
  0xe4   :  { %v520_v7 = vld [vmem:[#allocation2 + $0x60] sm:$0xff] }
  0xe5   :  { %503 = vst [vmem:[#allocation2 + $0x80] sm:$0xf] %v499_v58  ;;  %v470_v62 = vpop.permute.xlu1 %469  ;;  %v468_v63 = vpop.permute.xlu0 %467  ;;  %v702_v17 = vpack.c.bf16 %v520_v7, %v516_v15 }
  0xe6   :  { %v475_v6 = vsel %vm471_vm8, %v470_v62, %v464_v56  ;;  %v472_v0 = vsel %vm471_vm8, %v468_v63, %v470_v62  ;;  %v473_v1 = vsel %vm471_vm8, %v466_v55, %v468_v63 }
  0xe7   :  { %v502_v3 = vmul.f32 %v494_v59, %v475_v6  ;;  %v500_v4 = vmul.f32 %v486_v60, %v473_v1  ;;  %v501_v9 = vmul.f32 %v490_v61, %v472_v0 }
  0xe8   :  { %v521_v10 = vld [vmem:[#allocation2 + $0x68] sm:$0xff]  ;;  %v523_v11 = vld [vmem:[#allocation2 + $0x78] sm:$0xff] }
  0xe9   :  { %v522_v12 = vld [vmem:[#allocation2 + $0x70] sm:$0xff]  ;;  %506 = vst [vmem:[#allocation2 + $0x98] sm:$0xf] %v502_v3  ;;  %504 = vst [vmem:[#allocation2 + $0x88] sm:$0xf] %v500_v4  ;;  %v700_v13 = vpack.c.bf16 %v521_v10, %v517_v2  ;;  %v708_v14 = vpack.c.bf16 %v523_v11, %v519_v5 }
  0xea   :  { %505 = vst [vmem:[#allocation2 + $0x90] sm:$0xf] %v501_v9  ;;  %v710_v16 = vpack.c.bf16 %v522_v12, %v518_v8 }
  0xeb   :  { %701 = vmatprep.subr.bf16.mxu0 %v700_v13  ;;  %709 = vmatprep.subr.bf16.mxu1 %v708_v14 }
  0xec   :  { %703 = vmatpush1.bf16.msra.mxu0 %v702_v17  ;;  %711 = vmatpush1.bf16.msra.mxu1 %v710_v16  ;;  %v524_v21 = vld [vmem:[#allocation2 + $0x80] sm:$0xff] }
  0xf0   :  { %v525_v18 = vld [vmem:[#allocation2 + $0x88] sm:$0xff]  ;;  %v527_v19 = vld [vmem:[#allocation2 + $0x98] sm:$0xff] }
  0xf1   :  { %v526_v20 = vld [vmem:[#allocation2 + $0x90] sm:$0xff]  ;;  %540 = vmatprep.subr.mxu0 %v525_v18  ;;  %611 = vmatprep.subr.mxu1 %v527_v19 }
  0xf2   :  { %541 = vmatpush1.msra.mxu0 %v524_v21  ;;  %612 = vmatpush1.msra.mxu1 %v526_v20 }
  0xf3   :  { %694 = vmatmul.mubr.msk.f32.vlgmr.msra.gmra.mrb[0].mxu0 %vm528_vm9, %v507_v23  ;;  %695 = vmatmul.mubr.msk.f32.vlgmr.msra.gmra.mrb[0].mxu1 %vm528_vm9, %v507_v23 }
 0x1c6   :  { %v598_v22 = vpop.f32.mrb[0].mxu0  ;;  %v669_v24 = vpop.f32.mrb[0].mxu1 }
 0x1c7   :  { %674 = vst [vmem:[#allocation9] sm:$0xff] %v598_v22  ;;  %676 = vst [vmem:[#allocation9 + $0x10] sm:$0xff] %v669_v24  ;;  %v600_v25 = vpop.f32.mrb[1].mxu0  ;;  %v671_v26 = vpop.f32.mrb[1].mxu1 }
 0x1c8   :  { %675 = vst [vmem:[#allocation9 + $0x8] sm:$0xff] %v600_v25  ;;  %677 = vst [vmem:[#allocation9 + $0x18] sm:$0xff] %v671_v26 }
 0x1c9   :  { %807 = shalt.err (!%p804_p0)
}
 0x1ca   :  { %s808_s6 = scalar_lea.hbm %s1065_s3, 512 }
 0x1cb   :  { %p809_p1 = scmp.ne.s32.totalorder %s1065_s3, %s808_s6  ;;  %p812_p2 = scmp.lt.u32.totalorder %s808_s6, %s1065_s3 }
 0x1cd   :  { %p814_p3 = pnand %p812_p2, %p809_p1 }
 0x1cf   :  { %817 = shalt.err (!%p814_p3)
}
 0x1d0   :  { %687 = dma.vmem_to_hbm [thread:$0]  %s685_s29, 512, %s1065_s3, [#allocation5]  }
 0x1d1   :  { %822 = dma.done.wait [#allocation5], 512  }
 0x1d2   :  { %823 = vsyncadd [#allocation5], 4294966784 }
 0x1d3   :  { %691 = vsyncpa [#allocation4], 1 }
 0x1d4   :  { %692 = vsyncpa [#allocation7], 1 }
 0x1d5   :  { %693 = vsyncpa [#allocation5], 1 }

</bundles_post_ra>
